<compile_context>
chip_gen: v7x
topology: tpu7x:2x2x1
jax: 0.10.0
libtpu: 0.0.40
codegen_flags: <defaults>
</compile_context>

<pallas_src>
import functools

import jax
import jax.numpy as jnp
from jax.experimental import pallas as pl
from jax.experimental.pallas import tpu as pltpu


def _round_up(x, m):
    return (x + m - 1) // m * m


def _tpu_generation():
    try:
        kind = jax.devices()[0].device_kind.lower()
    except Exception:
        return "unknown"
    if "7" in kind:
        return "v7x"
    if "v6" in kind:
        return "v6e"
    if "v5" in kind:
        return "v5e"
    return "unknown"


def _choose_tile_b(B, gen):
    b8 = _round_up(max(B, 1), 8)
    if gen == "v7x":
        # Two TensorCores share the "parallel" batch axis: aim for >=4 grid
        # steps (>=2 per core) so each core's x/out DMAs double-buffer; with a
        # tiny batch fall back to a single step (nothing to pipeline).
        if b8 >= 32:
            return min(256, _round_up(pl.cdiv(b8, 4), 8))
        return b8
    if gen == "v5e":
        # 4x128 MXU + one vector-store slot: 128-256 rows already saturate it.
        return min(256, b8)
    # v6e / unknown: big tiles amortize per-step overhead (~0.35us); a single
    # step is best when the whole batch fits.
    return min(512, b8)


def _resident_spec(shape):
    """Grid-invariant operand: constant index_map (fetched once), single-buffered."""
    return pl.BlockSpec(shape, lambda i: (0,) * len(shape),
                        pipeline_mode=pl.Buffered(1))


def autoencoder_kernel(x_ref, w1_ref, b1_ref, w2_ref, b2_ref, o_ref, *,
                       decoder_sigmoid):
    # Encoder: h = sigmoid(x @ W1 + b1).  Weights arrive pre-cast to bf16;
    # only the activation tile is (cheaply) cast here (no-op if x is bf16).
    x = x_ref[...].astype(jnp.bfloat16)
    h = jnp.dot(x, w1_ref[...], preferred_element_type=jnp.float32)
    h = h + b1_ref[...]
    # sigmoid = 1 / (1 + exp(-h)): exp and reciprocal both run on the EUP slot.
    h = pl.reciprocal(1.0 + jnp.exp(-h))
    # Decoder: y = h @ W2 + b2 (+ optional sigmoid).
    y = jnp.dot(h.astype(jnp.bfloat16), w2_ref[...],
                preferred_element_type=jnp.float32)
    y = y + b2_ref[...]
    if decoder_sigmoid:
        y = pl.reciprocal(1.0 + jnp.exp(-y))
    o_ref[...] = y.astype(o_ref.dtype)


def prepare_params(w1, b1, w2, b2, *, weight_dtype=jnp.bfloat16):
    """Pad to lane multiples and cast weights once, outside the hot path.

    w1: (D, H)  b1: (H,) or (1, H)   w2: (H, D)  b2: (D,) or (1, D)
    (These are the transposes of PyTorch's nn.Linear (out, in) storage.)
    """
    D, H = w1.shape
    Dp, Hp = _round_up(D, 128), _round_up(H, 128)
    w1p = jnp.zeros((Dp, Hp), weight_dtype).at[:D, :H].set(w1.astype(weight_dtype))
    w2p = jnp.zeros((Hp, Dp), weight_dtype).at[:H, :D].set(w2.astype(weight_dtype))
    b1p = jnp.zeros((1, Hp), jnp.float32).at[:, :H].set(
        b1.reshape(1, H).astype(jnp.float32))
    b2p = jnp.zeros((1, Dp), jnp.float32).at[:, :D].set(
        b2.reshape(1, D).astype(jnp.float32))
    return {"w1": w1p, "b1": b1p, "w2": w2p, "b2": b2p,
            "input_dim": D, "hidden_dim": H}


def autoencoder_forward(x, params, *, decoder_sigmoid=False, tile_b=None):
    """x: (B, D) -> (B, D), using prepare_params() output."""
    B, D = x.shape
    assert D == params["input_dim"]
    w1p, b1p, w2p, b2p = params["w1"], params["b1"], params["w2"], params["b2"]
    Dp, Hp = w1p.shape

    gen = _tpu_generation()
    if tile_b is None:
        tile_b = _choose_tile_b(B, gen)
    tile_b = _round_up(tile_b, 8)
    Bp = _round_up(B, tile_b)
    grid = (Bp // tile_b,)

    # Skip the activation pad / unpad round-trips when shapes already line up.
    need_pad = (Bp != B) or (Dp != D)
    if need_pad:
        xp = jnp.zeros((Bp, Dp), x.dtype).at[:B, :D].set(x)
    else:
        xp = x

    # VMEM budget (bytes): pipelined x/out tiles + single-buffered bf16 weights
    # + f32 biases + in-kernel temporaries, with 2x margin.
    n_io_buf = 2 if grid[0] > 1 else 1
    io_bytes = jnp.dtype(x.dtype).itemsize
    w_bytes = jnp.dtype(w1p.dtype).itemsize
    vmem_bytes = (
        n_io_buf * tile_b * Dp * io_bytes      # x tiles
        + n_io_buf * tile_b * Dp * io_bytes    # out tiles
        + (Dp * Hp + Hp * Dp) * w_bytes        # resident weights (single-buffered)
        + (Hp + Dp) * 4                        # resident f32 biases
        + tile_b * Hp * (4 + 2)                # f32 hidden + bf16 copy
        + tile_b * Dp * 4                      # f32 decoder accumulator
    )
    # Per-generation cap: v7x has only 64 MiB physical (leave ~15% headroom);
    # v5e/v6e have 128 MiB, so allow well past the default scoped limit.
    caps = {"v5e": 100 << 20, "v6e": 100 << 20, "v7x": 54 << 20}
    cap = caps.get(gen, 32 << 20)
    vmem_limit = int(max(16 << 20, min(2 * vmem_bytes, cap)))

    kernel = functools.partial(autoencoder_kernel,
                               decoder_sigmoid=decoder_sigmoid)

    out_padded = pl.pallas_call(
        kernel,
        out_shape=jax.ShapeDtypeStruct((Bp, Dp), x.dtype),
        grid=grid,
        in_specs=[
            pl.BlockSpec((tile_b, Dp), lambda i: (i, 0)),  # x tile (pipelined)
            _resident_spec((Dp, Hp)),                      # W1 (bf16, resident)
            _resident_spec((1, Hp)),                       # b1 (f32, resident)
            _resident_spec((Hp, Dp)),                      # W2 (bf16, resident)
            _resident_spec((1, Dp)),                       # b2 (f32, resident)
        ],
        out_specs=pl.BlockSpec((tile_b, Dp), lambda i: (i, 0)),
        compiler_params=pltpu.CompilerParams(
            dimension_semantics=("parallel",),
            vmem_limit_bytes=vmem_limit,
        ),
    )(xp, w1p, b1p, w2p, b2p)

    if need_pad:
        return out_padded[:B, :D]
    return out_padded


if __name__ == "__main__":
    # Shapes consistent with the module: hidden_dim defaults to 0.75*input_dim.
    # input_dim=128 keeps the feature axis lane-dense (no runtime padding).
    batch = 256
    input_dim = 128
    hidden_dim = int(0.75 * input_dim)  # 96

    key = jax.random.PRNGKey(0)
    kx, k1, kb1, k2, kb2 = jax.random.split(key, 5)

    x = jax.random.normal(kx, (batch, input_dim), dtype=jnp.float32)

    # Deterministic synthetic parameters (PyTorch Linear stores (out, in);
    # we store the transpose (in, out) for the kernel).
    w1 = jax.random.normal(k1, (input_dim, hidden_dim), dtype=jnp.float32) * 0.1
    b1 = jax.random.normal(kb1, (hidden_dim,), dtype=jnp.float32) * 0.1
    w2 = jax.random.normal(k2, (hidden_dim, input_dim), dtype=jnp.float32) * 0.1
    b2 = jax.random.normal(kb2, (input_dim,), dtype=jnp.float32) * 0.1

    params = prepare_params(w1, b1, w2, b2)
    out = autoencoder_forward(x, params, decoder_sigmoid=False)
    out = jax.block_until_ready(out)

    # Pure-JAX f32 reference of the same forward pass (bf16 MXU weights in the
    # kernel => relaxed tolerance; f32 accumulation keeps the error small).
    h_ref = jax.nn.sigmoid(x @ w1 + b1[None, :])
    y_ref = h_ref @ w2 + b2[None, :]
    assert out.shape == (batch, input_dim)
    assert jnp.allclose(out, y_ref, atol=2.5e-2, rtol=2.5e-2), (
        float(jnp.max(jnp.abs(out - y_ref))))

    print("KERNEL_OK")
</pallas_src>

<mosaic_0001>
module attributes {stable_mosaic.version = 11 : i64} {
  func.func @autoencoder_kernel(%arg0: i32, %arg1: memref<256x128xf32, #tpu.memory_space<vmem>>, %arg2: memref<128x128xbf16, #tpu.memory_space<vmem>>, %arg3: memref<1x128xf32, #tpu.memory_space<vmem>>, %arg4: memref<128x128xbf16, #tpu.memory_space<vmem>>, %arg5: memref<1x128xf32, #tpu.memory_space<vmem>>, %arg6: memref<256x128xf32, #tpu.memory_space<vmem>>) attributes {dimension_semantics = [#tpu.dimension_semantics<parallel>], iteration_bounds = array<i64: 1>, scalar_prefetch = 0 : i64, scratch_operands = 0 : i64, tpu.core_type = #tpu.core_type<tc>, window_params = [{transform_indices = @transform_0, window_bounds = array<i64: 256, 128>}, {pipeline_mode = #tpu.pipeline_mode<synchronous>, transform_indices = @transform_1, window_bounds = array<i64: 128, 128>}, {pipeline_mode = #tpu.pipeline_mode<synchronous>, transform_indices = @transform_2, window_bounds = array<i64: 1, 128>}, {pipeline_mode = #tpu.pipeline_mode<synchronous>, transform_indices = @transform_3, window_bounds = array<i64: 128, 128>}, {pipeline_mode = #tpu.pipeline_mode<synchronous>, transform_indices = @transform_4, window_bounds = array<i64: 1, 128>}, {transform_indices = @transform_5, window_bounds = array<i64: 256, 128>}]} {
    %c0 = arith.constant 0 : index
    %c0_0 = arith.constant 0 : index
    %0 = vector.load %arg1[%c0, %c0_0] : memref<256x128xf32, #tpu.memory_space<vmem>>, vector<256x128xf32>
    %1 = arith.truncf %0 : vector<256x128xf32> to vector<256x128xbf16>
    %c0_1 = arith.constant 0 : index
    %c0_2 = arith.constant 0 : index
    %2 = vector.load %arg2[%c0_1, %c0_2] : memref<128x128xbf16, #tpu.memory_space<vmem>>, vector<128x128xbf16>
    %cst = arith.constant dense<0.000000e+00> : vector<256x128xf32>
    %3 = tpu.matmul %1, %2, %cst {dimension_numbers = #tpu.dot_dimension_numbers<[1], [0], [0], [1], [0, 0, 1, 1], [], []>} : vector<256x128xbf16>, vector<128x128xbf16>, vector<256x128xf32> -> vector<256x128xf32>
    %c0_3 = arith.constant 0 : index
    %c0_4 = arith.constant 0 : index
    %4 = vector.load %arg3[%c0_3, %c0_4] : memref<1x128xf32, #tpu.memory_space<vmem>>, vector<1x128xf32>
    %5 = vector.broadcast %4 : vector<1x128xf32> to vector<256x128xf32>
    %6 = arith.addf %3, %5 : vector<256x128xf32>
    %cst_5 = arith.constant 0.000000e+00 : f32
    %7 = vector.broadcast %cst_5 : f32 to vector<256x128xf32>
    %8 = arith.subf %7, %6 : vector<256x128xf32>
    %9 = math.exp %8 : vector<256x128xf32>
    %cst_6 = arith.constant 1.000000e+00 : f32
    %10 = vector.broadcast %cst_6 : f32 to vector<256x128xf32>
    %11 = arith.addf %10, %9 : vector<256x128xf32>
    %12 = tpu.reciprocal %11 : vector<256x128xf32> -> vector<256x128xf32>
    %13 = arith.truncf %12 : vector<256x128xf32> to vector<256x128xbf16>
    %c0_7 = arith.constant 0 : index
    %c0_8 = arith.constant 0 : index
    %14 = vector.load %arg4[%c0_7, %c0_8] : memref<128x128xbf16, #tpu.memory_space<vmem>>, vector<128x128xbf16>
    %cst_9 = arith.constant dense<0.000000e+00> : vector<256x128xf32>
    %15 = tpu.matmul %13, %14, %cst_9 {dimension_numbers = #tpu.dot_dimension_numbers<[1], [0], [0], [1], [0, 0, 1, 1], [], []>} : vector<256x128xbf16>, vector<128x128xbf16>, vector<256x128xf32> -> vector<256x128xf32>
    %c0_10 = arith.constant 0 : index
    %c0_11 = arith.constant 0 : index
    %16 = vector.load %arg5[%c0_10, %c0_11] : memref<1x128xf32, #tpu.memory_space<vmem>>, vector<1x128xf32>
    %17 = vector.broadcast %16 : vector<1x128xf32> to vector<256x128xf32>
    %18 = arith.addf %15, %17 : vector<256x128xf32>
    %c0_12 = arith.constant 0 : index
    %c0_13 = arith.constant 0 : index
    %19 = vector.load %arg6[%c0_12, %c0_13] : memref<256x128xf32, #tpu.memory_space<vmem>>, vector<256x128xf32>
    tpu.vector_store %arg6[%c0_12, %c0_13], %18 {strides = array<i32>} : memref<256x128xf32, #tpu.memory_space<vmem>>, vector<256x128xf32>,
    return
  }
  func.func @transform_0(%arg0: i32) -> (i32, i32) {
    %c0_i32 = arith.constant 0 : i32
    %c0_i32_0 = arith.constant 0 : i32
    return %arg0, %c0_i32 : i32, i32
  }
  func.func @transform_1(%arg0: i32) -> (i32, i32) {
    %c0_i32 = arith.constant 0 : i32
    %c0_i32_0 = arith.constant 0 : i32
    %c0_i32_1 = arith.constant 0 : i32
    return %c0_i32, %c0_i32_0 : i32, i32
  }
  func.func @transform_2(%arg0: i32) -> (i32, i32) {
    %c0_i32 = arith.constant 0 : i32
    %c0_i32_0 = arith.constant 0 : i32
    %c0_i32_1 = arith.constant 0 : i32
    return %c0_i32, %c0_i32_0 : i32, i32
  }
  func.func @transform_3(%arg0: i32) -> (i32, i32) {
    %c0_i32 = arith.constant 0 : i32
    %c0_i32_0 = arith.constant 0 : i32
    %c0_i32_1 = arith.constant 0 : i32
    return %c0_i32, %c0_i32_0 : i32, i32
  }
  func.func @transform_4(%arg0: i32) -> (i32, i32) {
    %c0_i32 = arith.constant 0 : i32
    %c0_i32_0 = arith.constant 0 : i32
    %c0_i32_1 = arith.constant 0 : i32
    return %c0_i32, %c0_i32_0 : i32, i32
  }
  func.func @transform_5(%arg0: i32) -> (i32, i32) {
    %c0_i32 = arith.constant 0 : i32
    %c0_i32_0 = arith.constant 0 : i32
    return %arg0, %c0_i32 : i32, i32
  }
}

</mosaic_0001>

<bundles_post_ra>
// kernel: tpu_custom_call.1
= control target key start
LH: loop header
LB: loop body
LE: loop exit
PB: predicated region body
PF: predicated region fallthrough
CT: control target
= control target key end

     0   :  { %10 = vsyncpa [#allocation3], 0  ;;  %s1381_s0 = inlined_call_operand.hbm [shape: f32[256,128], index: 0, kind: input, shape index: {}]   ;;  %s1382_s1 = inlined_call_operand.hbm [shape: bf16[128,128], index: 1, kind: input, shape index: {}]   ;;  %s1383_s2 = inlined_call_operand.vmem [shape: f32[1,128], index: 2, kind: input, shape index: {}]   ;;  %s1384_s3 = inlined_call_operand.hbm [shape: bf16[128,128], index: 3, kind: input, shape index: {}]   ;;  %s1385_s4 = inlined_call_operand.vmem [shape: f32[1,128], index: 4, kind: input, shape index: {}]   ;;  %s1386_s5 = inlined_call_operand.hbm [shape: f32[256,128], index: 5, kind: output, shape index: {}]  }
   0x1   :  { %11 = vsyncpa [#allocation6], 0 }
   0x2   :  { %12 = vsyncpa [#allocation4], 0  ;;  %s1209_s18 = smov [#allocation5]   ;;  %s1115_s22 = scalar_lea.hbm %s1382_s1, 1024 }
   0x3   :  { %s30_s19 = sshll.u32 %s1209_s18, 4  ;;  %p1116_p0 = scmp.ne.s32.totalorder %s1382_s1, %s1115_s22  ;;  %s31_s19 = int_to_ptr.vmem [resolvable:$true] %s30_s19 }
   0x4   :  { %p1119_p1 = scmp.lt.u32.totalorder %s1115_s22, %s1382_s1 }
   0x6   :  { %p1121_p2 = pnand %p1119_p1, %p1116_p0 }
   0x8   :  { %1124 = shalt.err (!%p1121_p2)
}
   0x9   :  { %s1125_s27 = scalar_lea.vmem %s31_s19, 1024  ;;  %p1130_p4 = scmp.lt.s32.totalorder %s31_s19, %s31_s19 }
   0xa   :  { %p1126_p3 = scmp.ne.s32.totalorder %s31_s19, %s1125_s27  ;;  %p1131_p5 = scmp.lt.s32.totalorder %s1125_s27, %s1125_s27 }
   0xc   :  { %p1132_p6 = por %p1131_p5, %p1130_p4 }
   0xe   :  { %p1133_p7 = pnand %p1132_p6, %p1126_p3 }
  0x10   :  { %1136 = shalt.err (!%p1133_p7)
}
  0x11   :  { %s1210_s28 = smov 64   ;;  %s1211_s29 = smov 4  }
  0x12   :  { %36 = dma.hbm_to_vmem [thread:$0]  %s1382_s1, 1024, %s31_s19, [#allocation6], %s1210_s28, %s1210_s28, %s1211_s29  }
  0x13   :  { %s1212_s7 = smov [#allocation2]   ;;  %s1137_s11 = scalar_lea.hbm %s1381_s0, 4096 }
  0x14   :  { %s18_s8 = sshll.u32 %s1212_s7, 4  ;;  %p1138_p8 = scmp.ne.s32.totalorder %s1381_s0, %s1137_s11  ;;  %s19_s8 = int_to_ptr.vmem [resolvable:$true] %s18_s8 }
  0x15   :  { %p1141_p9 = scmp.lt.u32.totalorder %s1137_s11, %s1381_s0 }
  0x17   :  { %p1143_p10 = pnand %p1141_p9, %p1138_p8 }
  0x19   :  { %1146 = shalt.err (!%p1143_p10)
}
  0x1a   :  { %s1147_s16 = scalar_lea.vmem %s19_s8, 4096  ;;  %p1152_p12 = scmp.lt.s32.totalorder %s19_s8, %s19_s8 }
  0x1b   :  { %p1148_p11 = scmp.ne.s32.totalorder %s19_s8, %s1147_s16  ;;  %p1153_p13 = scmp.lt.s32.totalorder %s1147_s16, %s1147_s16 }
  0x1d   :  { %p1154_p0 = por %p1153_p13, %p1152_p12 }
  0x1f   :  { %p1155_p1 = pnand %p1154_p0, %p1148_p11 }
  0x21   :  { %1158 = shalt.err (!%p1155_p1)
}
  0x22   :  { %s1213_s1 = smov 128   ;;  %s1214_s17 = smov 8  }
  0x23   :  { %24 = dma.hbm_to_vmem [thread:$0]  %s1381_s0, 4096, %s19_s8, [#allocation3], %s1213_s1, %s1213_s1, %s1214_s17  }
  0x24   :  { %s1215_s20 = smov [#allocation7]   ;;  %s1159_s24 = scalar_lea.hbm %s1384_s3, 1024 }
  0x25   :  { %s44_s21 = sshll.u32 %s1215_s20, 4  ;;  %p1160_p2 = scmp.ne.s32.totalorder %s1384_s3, %s1159_s24  ;;  %s45_s21 = int_to_ptr.vmem [resolvable:$true] %s44_s21 }
  0x26   :  { %p1163_p3 = scmp.lt.u32.totalorder %s1159_s24, %s1384_s3 }
  0x28   :  { %p1165_p4 = pnand %p1163_p3, %p1160_p2 }
  0x2a   :  { %1168 = shalt.err (!%p1165_p4)
}
  0x2b   :  { %s1169_s6 = scalar_lea.vmem %s45_s21, 1024  ;;  %p1174_p6 = scmp.lt.s32.totalorder %s45_s21, %s45_s21 }
  0x2c   :  { %p1170_p5 = scmp.ne.s32.totalorder %s45_s21, %s1169_s6  ;;  %p1175_p7 = scmp.lt.s32.totalorder %s1169_s6, %s1169_s6 }
  0x2e   :  { %p1176_p8 = por %p1175_p7, %p1174_p6 }
  0x30   :  { %p1177_p9 = pnand %p1176_p8, %p1170_p5 }
  0x32   :  { %1180 = shalt.err (!%p1177_p9)
}
  0x33   :  { %50 = dma.hbm_to_vmem [thread:$0]  %s1384_s3, 1024, %s45_s21, [#allocation6], %s1210_s28, %s1210_s28, %s1211_s29  }
  0x34   :  { %1203 = dma.done.wait [#allocation3], 4096  }
  0x35   :  { %1204 = vsyncadd [#allocation3], 4294963200 }
  0x36   :  { %1205 = dma.done.wait [#allocation6], 2048  }
  0x37   :  { %1206 = vsyncadd [#allocation6], 4294965248  ;;  %v971_v0 = vld [vmem:[#allocation5] sm:$0xff]   ;;  %v972_v1 = vld [vmem:[#allocation5 + $0x8] sm:$0xff]  }
  0x38   :  { %867 = vmatprep.subr.bf16.mxu0 %v971_v0  ;;  %v973_v2 = vld [vmem:[#allocation5 + $0x10] sm:$0xff]   ;;  %v974_v3 = vld [vmem:[#allocation5 + $0x18] sm:$0xff]   ;;  %v63_v4 = vld [vmem:[#allocation2] sm:$0xff] }
  0x39   :  { %868 = vmatpush3.bf16.msra.mxu0 %v971_v0  ;;  %v64_v5 = vld [vmem:[#allocation2 + $0x8] sm:$0xff]  ;;  %v975_v7 = vld [vmem:[#allocation5 + $0x20] sm:$0xff]   ;;  %v977_v9 = vld [vmem:[#allocation5 + $0x30] sm:$0xff]  }
  0x3a   :  { %869 = vmatprep.subr.bf16.mxu0 %v972_v1  ;;  %v95_v6 = vpack.c.bf16 %v64_v5, %v63_v4  ;;  %v976_v8 = vld [vmem:[#allocation5 + $0x28] sm:$0xff]   ;;  %v978_v10 = vld [vmem:[#allocation5 + $0x38] sm:$0xff]   ;;  %v65_v11 = vld [vmem:[#allocation2 + $0x10] sm:$0xff] }
  0x3b   :  { %v66_v12 = vld [vmem:[#allocation2 + $0x18] sm:$0xff]  ;;  %v67_v13 = vld [vmem:[#allocation2 + $0x20] sm:$0xff]  ;;  %v68_v14 = vld [vmem:[#allocation2 + $0x28] sm:$0xff] }
  0x3c   :  { %883 = vmatprep.mubr.bf16.mxu0 %v95_v6  ;;  %v96_v15 = vpack.c.bf16 %v66_v12, %v65_v11  ;;  %v97_v16 = vpack.c.bf16 %v68_v14, %v67_v13  ;;  %v69_v17 = vld [vmem:[#allocation2 + $0x30] sm:$0xff]  ;;  %v70_v18 = vld [vmem:[#allocation2 + $0x38] sm:$0xff]  ;;  %v71_v19 = vld [vmem:[#allocation2 + $0x40] sm:$0xff] }
  0x3d   :  { %870 = vmatpush3.bf16.msra.mxu0 %v972_v1  ;;  %v72_v20 = vld [vmem:[#allocation2 + $0x48] sm:$0xff]  ;;  %v98_v21 = vpack.c.bf16 %v70_v18, %v69_v17  ;;  %v73_v23 = vld [vmem:[#allocation2 + $0x50] sm:$0xff]  ;;  %v74_v24 = vld [vmem:[#allocation2 + $0x58] sm:$0xff] }
  0x3e   :  { %871 = vmatprep.subr.bf16.mxu0 %v973_v2  ;;  %v99_v22 = vpack.c.bf16 %v72_v20, %v71_v19  ;;  %v75_v25 = vld [vmem:[#allocation2 + $0x60] sm:$0xff]  ;;  %v76_v26 = vld [vmem:[#allocation2 + $0x68] sm:$0xff]  ;;  %v100_v27 = vpack.c.bf16 %v74_v24, %v73_v23  ;;  %v77_v29 = vld [vmem:[#allocation2 + $0x70] sm:$0xff] }
  0x3f   :  { %v101_v28 = vpack.c.bf16 %v76_v26, %v75_v25  ;;  %v78_v30 = vld [vmem:[#allocation2 + $0x78] sm:$0xff]  ;;  %v79_v31 = vld [vmem:[#allocation2 + $0x80] sm:$0xff]  ;;  %v80_v32 = vld [vmem:[#allocation2 + $0x88] sm:$0xff] }
  0x40   :  { %v102_v33 = vpack.c.bf16 %v78_v30, %v77_v29  ;;  %v103_v34 = vpack.c.bf16 %v80_v32, %v79_v31  ;;  %v81_v35 = vld [vmem:[#allocation2 + $0x90] sm:$0xff]  ;;  %v82_v36 = vld [vmem:[#allocation2 + $0x98] sm:$0xff]  ;;  %v83_v37 = vld [vmem:[#allocation2 + $0xa0] sm:$0xff] }
  0x41   :  { %872 = vmatpush3.bf16.msra.mxu0 %v973_v2  ;;  %v84_v38 = vld [vmem:[#allocation2 + $0xa8] sm:$0xff]  ;;  %v104_v39 = vpack.c.bf16 %v82_v36, %v81_v35  ;;  %v85_v41 = vld [vmem:[#allocation2 + $0xb0] sm:$0xff]  ;;  %v86_v42 = vld [vmem:[#allocation2 + $0xb8] sm:$0xff] }
  0x42   :  { %873 = vmatprep.subr.bf16.mxu0 %v974_v3  ;;  %v105_v40 = vpack.c.bf16 %v84_v38, %v83_v37  ;;  %v87_v43 = vld [vmem:[#allocation2 + $0xc0] sm:$0xff]  ;;  %v88_v44 = vld [vmem:[#allocation2 + $0xc8] sm:$0xff]  ;;  %v106_v45 = vpack.c.bf16 %v86_v42, %v85_v41  ;;  %v89_v47 = vld [vmem:[#allocation2 + $0xd0] sm:$0xff] }
  0x43   :  { %v107_v46 = vpack.c.bf16 %v88_v44, %v87_v43  ;;  %v90_v48 = vld [vmem:[#allocation2 + $0xd8] sm:$0xff]  ;;  %v91_v49 = vld [vmem:[#allocation2 + $0xe0] sm:$0xff]  ;;  %v92_v50 = vld [vmem:[#allocation2 + $0xe8] sm:$0xff] }
  0x44   :  { %v108_v51 = vpack.c.bf16 %v90_v48, %v89_v47  ;;  %v109_v52 = vpack.c.bf16 %v92_v50, %v91_v49  ;;  %v93_v53 = vld [vmem:[#allocation2 + $0xf0] sm:$0xff]  ;;  %v94_v54 = vld [vmem:[#allocation2 + $0xf8] sm:$0xff]  ;;  %v979_v56 = vld [vmem:[#allocation7] sm:$0xff]  }
  0x45   :  { %874 = vmatpush3.bf16.msra.mxu0 %v974_v3  ;;  %v110_v55 = vpack.c.bf16 %v94_v54, %v93_v53  ;;  %915 = vmatprep.subr.bf16.mxu1 %v979_v56  ;;  %v980_v57 = vld [vmem:[#allocation7 + $0x8] sm:$0xff]   ;;  %v981_v58 = vld [vmem:[#allocation7 + $0x10] sm:$0xff]   ;;  %v982_v59 = vld [vmem:[#allocation7 + $0x18] sm:$0xff]  }
  0x46   :  { %875 = vmatprep.subr.bf16.mxu0 %v975_v7  ;;  %916 = vmatpush3.bf16.msra.mxu1 %v979_v56  ;;  %v983_v60 = vld [vmem:[#allocation7 + $0x20] sm:$0xff]   ;;  %v984_v61 = vld [vmem:[#allocation7 + $0x28] sm:$0xff]   ;;  %v985_v62 = vld [vmem:[#allocation7 + $0x30] sm:$0xff]  }
  0x47   :  { %917 = vmatprep.subr.bf16.mxu1 %v980_v57  ;;  %v986_v63 = vld [vmem:[#allocation7 + $0x38] sm:$0xff]   ;;  %v1295_v0 = vld [vmem:[%s1383_s2] ss:$0 sm:$0xff] }
  0x49   :  { %876 = vmatpush3.bf16.msra.mxu0 %v975_v7 }
  0x4a   :  { %877 = vmatprep.subr.bf16.mxu0 %v976_v8  ;;  %918 = vmatpush3.bf16.msra.mxu1 %v980_v57 }
  0x4b   :  { %919 = vmatprep.subr.bf16.mxu1 %v981_v58 }
  0x4d   :  { %878 = vmatpush3.bf16.msra.mxu0 %v976_v8 }
  0x4e   :  { %879 = vmatprep.subr.bf16.mxu0 %v977_v9  ;;  %920 = vmatpush3.bf16.msra.mxu1 %v981_v58 }
  0x4f   :  { %921 = vmatprep.subr.bf16.mxu1 %v982_v59 }
  0x51   :  { %880 = vmatpush3.bf16.msra.mxu0 %v977_v9 }
  0x52   :  { %881 = vmatprep.subr.bf16.mxu0 %v978_v10  ;;  %922 = vmatpush3.bf16.msra.mxu1 %v982_v59 }
  0x53   :  { %923 = vmatprep.subr.bf16.mxu1 %v983_v60 }
  0x55   :  { %882 = vmatpush3.bf16.msra.mxu0 %v978_v10 }
  0x56   :  { %924 = vmatpush3.bf16.msra.mxu1 %v983_v60 }
  0x57   :  { %925 = vmatprep.subr.bf16.mxu1 %v984_v61 }
  0x58   :  { %884 = vmatmul.mubr.bf16.vlgmr.msra.gmra.mrb[0].mxu0 %v96_v15 }
  0x59   :  { %887 = vmatprep.mubr.bf16.mxu0 %v97_v16 }
  0x5a   :  { %926 = vmatpush3.bf16.msra.mxu1 %v984_v61 }
  0x5b   :  { %927 = vmatprep.subr.bf16.mxu1 %v985_v62 }
  0x5e   :  { %928 = vmatpush3.bf16.msra.mxu1 %v985_v62 }
  0x5f   :  { %929 = vmatprep.subr.bf16.mxu1 %v986_v63 }
  0x60   :  { %888 = vmatmul.mubr.bf16.gmra.mrb[4].mxu0 %v98_v21 }
  0x61   :  { %891 = vmatprep.mubr.bf16.mxu0 %v99_v22 }
  0x62   :  { %930 = vmatpush3.bf16.msra.mxu1 %v986_v63 }
  0x68   :  { %892 = vmatmul.mubr.bf16.gmra.mrb[8].mxu0 %v100_v27 }
  0x69   :  { %895 = vmatprep.mubr.bf16.mxu0 %v101_v28 }
  0x70   :  { %896 = vmatmul.mubr.bf16.gmra.mrb[12].mxu0 %v102_v33 }
  0x71   :  { %899 = vmatprep.mubr.bf16.mxu0 %v103_v34 }
  0x78   :  { %900 = vmatmul.mubr.bf16.gmra.mrb[16].mxu0 %v104_v39 }
  0x79   :  { %903 = vmatprep.mubr.bf16.mxu0 %v105_v40 }
  0x80   :  { %904 = vmatmul.mubr.bf16.gmra.mrb[20].mxu0 %v106_v45 }
  0x81   :  { %907 = vmatprep.mubr.bf16.mxu0 %v107_v46 }
  0x88   :  { %908 = vmatmul.mubr.bf16.gmra.mrb[24].mxu0 %v108_v51 }
  0x89   :  { %911 = vmatprep.mubr.bf16.mxu0 %v109_v52 }
  0x90   :  { %912 = vmatmul.mubr.bf16.gmra.mrb[28].mxu0 %v110_v55 }
 0x12b   :  { %v885_v1 = vpop.f32.mrb[0].mxu0 }
 0x12c   :  { %v225_v2 = vadd.f32 %v885_v1, %v1295_v0  ;;  %v216_v3 = vpop.f32.mrb[1].mxu0 }
 0x12d   :  { %v217_v4 = vadd.f32 %v1295_v0, %v216_v3  ;;  %v886_v5 = vpop.f32.mrb[2].mxu0 }
 0x12e   :  { %v345_v6 = vsub.f32 0.0, %v225_v2  ;;  %v228_v7 = vadd.f32 %v886_v5, %v1295_v0  ;;  %v219_v8 = vpop.f32.mrb[3].mxu0 }
 0x12f   :  { %v343_v9 = vsub.f32 0.0, %v217_v4  ;;  %v220_v10 = vadd.f32 %v1295_v0, %v219_v8 }
 0x130   :  { %v379_v11 = vmul.f32 1.442695, %v345_v6  ;;  %v346_v12 = vsub.f32 0.0, %v228_v7 }
 0x131   :  { %v375_v13 = vmul.f32 1.442695, %v343_v9  ;;  %v344_v14 = vsub.f32 0.0, %v220_v10 }
 0x132   :  { %987 = vpow2.f32 %v379_v11  ;;  %v381_v15 = vmul.f32 1.442695, %v346_v12 }
 0x133   :  { %989 = vpow2.f32 %v375_v13  ;;  %v377_v16 = vmul.f32 1.442695, %v344_v14  ;;  %v889_v17 = vpop.f32.mrb[4].mxu0 }
 0x134   :  { %991 = vpow2.f32 %v381_v15  ;;  %v241_v18 = vadd.f32 %v889_v17, %v1295_v0  ;;  %v232_v19 = vpop.f32.mrb[5].mxu0 }
 0x135   :  { %993 = vpow2.f32 %v377_v16  ;;  %v233_v20 = vadd.f32 %v1295_v0, %v232_v19  ;;  %v890_v21 = vpop.f32.mrb[6].mxu0 }
 0x136   :  { %v349_v22 = vsub.f32 0.0, %v241_v18  ;;  %v244_v23 = vadd.f32 %v890_v21, %v1295_v0  ;;  %v235_v24 = vpop.f32.mrb[7].mxu0 }
 0x137   :  { %v347_v25 = vsub.f32 0.0, %v233_v20  ;;  %v236_v26 = vadd.f32 %v1295_v0, %v235_v24 }
 0x138   :  { %v387_v27 = vmul.f32 1.442695, %v349_v22  ;;  %v350_v28 = vsub.f32 0.0, %v244_v23 }
 0x139   :  { %v383_v29 = vmul.f32 1.442695, %v347_v25  ;;  %v348_v30 = vsub.f32 0.0, %v236_v26 }
 0x13a   :  { %995 = vpow2.f32 %v387_v27  ;;  %v389_v31 = vmul.f32 1.442695, %v350_v28 }
 0x13b   :  { %997 = vpow2.f32 %v383_v29  ;;  %v385_v32 = vmul.f32 1.442695, %v348_v30  ;;  %v893_v33 = vpop.f32.mrb[8].mxu0 }
 0x13c   :  { %v988_v34 = vpop.eup %987  ;;  %999 = vpow2.f32 %v389_v31  ;;  %v257_v35 = vadd.f32 %v893_v33, %v1295_v0  ;;  %v248_v36 = vpop.f32.mrb[9].mxu0 }
 0x13d   :  { %v990_v37 = vpop.eup %989  ;;  %v441_v38 = vadd.f32 1.0, %v988_v34  ;;  %1001 = vpow2.f32 %v385_v32  ;;  %v249_v39 = vadd.f32 %v1295_v0, %v248_v36  ;;  %v894_v40 = vpop.f32.mrb[10].mxu0 }
 0x13e   :  { %v992_v41 = vpop.eup %991  ;;  %v439_v42 = vadd.f32 1.0, %v990_v37  ;;  %v353_v43 = vsub.f32 0.0, %v257_v35  ;;  %v260_v44 = vadd.f32 %v894_v40, %v1295_v0  ;;  %v251_v45 = vpop.f32.mrb[11].mxu0 }
 0x13f   :  { %v994_v46 = vpop.eup %993  ;;  %1003 = vrcp.f32 %v441_v38  ;;  %v442_v47 = vadd.f32 1.0, %v992_v41  ;;  %v351_v48 = vsub.f32 0.0, %v249_v39  ;;  %v252_v49 = vadd.f32 %v1295_v0, %v251_v45 }
 0x140   :  { %1005 = vrcp.f32 %v439_v42  ;;  %v440_v50 = vadd.f32 1.0, %v994_v46  ;;  %v395_v51 = vmul.f32 1.442695, %v353_v43  ;;  %v354_v52 = vsub.f32 0.0, %v260_v44 }
 0x141   :  { %1007 = vrcp.f32 %v442_v47  ;;  %v391_v53 = vmul.f32 1.442695, %v351_v48  ;;  %v352_v54 = vsub.f32 0.0, %v252_v49 }
 0x142   :  { %1009 = vrcp.f32 %v440_v50  ;;  %v397_v55 = vmul.f32 1.442695, %v354_v52 }
 0x143   :  { %1011 = vpow2.f32 %v395_v51  ;;  %v393_v56 = vmul.f32 1.442695, %v352_v54  ;;  %v897_v57 = vpop.f32.mrb[12].mxu0 }
 0x144   :  { %v996_v58 = vpop.eup %995  ;;  %1013 = vpow2.f32 %v391_v53  ;;  %v273_v59 = vadd.f32 %v897_v57, %v1295_v0  ;;  %v264_v60 = vpop.f32.mrb[13].mxu0 }
 0x145   :  { %v998_v61 = vpop.eup %997  ;;  %v445_v62 = vadd.f32 1.0, %v996_v58  ;;  %1015 = vpow2.f32 %v397_v55  ;;  %v265_v63 = vadd.f32 %v1295_v0, %v264_v60  ;;  %v898_v1 = vpop.f32.mrb[14].mxu0 }
 0x146   :  { %v1000_v2 = vpop.eup %999  ;;  %v443_v3 = vadd.f32 1.0, %v998_v61  ;;  %1017 = vpow2.f32 %v393_v56  ;;  %v357_v4 = vsub.f32 0.0, %v273_v59  ;;  %v276_v5 = vadd.f32 %v898_v1, %v1295_v0  ;;  %v267_v6 = vpop.f32.mrb[15].mxu0 }
 0x147   :  { %v1002_v7 = vpop.eup %1001  ;;  %1019 = vrcp.f32 %v445_v62  ;;  %v446_v8 = vadd.f32 1.0, %v1000_v2  ;;  %v355_v9 = vsub.f32 0.0, %v265_v63  ;;  %v268_v10 = vadd.f32 %v1295_v0, %v267_v6 }
 0x148   :  { %1021 = vrcp.f32 %v443_v3  ;;  %v444_v11 = vadd.f32 1.0, %v1002_v7  ;;  %v403_v12 = vmul.f32 1.442695, %v357_v4  ;;  %v358_v13 = vsub.f32 0.0, %v276_v5 }
 0x149   :  { %v1004_v14 = vpop.eup %1003  ;;  %1023 = vrcp.f32 %v446_v8  ;;  %v399_v15 = vmul.f32 1.442695, %v355_v9  ;;  %v356_v16 = vsub.f32 0.0, %v268_v10 }
 0x14a   :  { %v1006_v17 = vpop.eup %1005  ;;  %1025 = vrcp.f32 %v444_v11  ;;  %v405_v18 = vmul.f32 1.442695, %v358_v13 }
 0x14b   :  { %v1008_v19 = vpop.eup %1007  ;;  %1027 = vpow2.f32 %v403_v12  ;;  %v401_v20 = vmul.f32 1.442695, %v356_v16  ;;  %v901_v21 = vpop.f32.mrb[16].mxu0 }
 0x14c   :  { %v1010_v22 = vpop.eup %1009  ;;  %1029 = vpow2.f32 %v399_v15  ;;  %v289_v23 = vadd.f32 %v901_v21, %v1295_v0  ;;  %v280_v24 = vpop.f32.mrb[17].mxu0  ;;  %v504_v25 = vpack.c.bf16 %v1008_v19, %v1004_v14 }
 0x14d   :  { %v1012_v26 = vpop.eup %1011  ;;  %1031 = vpow2.f32 %v405_v18  ;;  %v281_v27 = vadd.f32 %v1295_v0, %v280_v24  ;;  %v902_v28 = vpop.f32.mrb[18].mxu0  ;;  %v503_v29 = vpack.c.bf16 %v1010_v22, %v1006_v17 }
 0x14e   :  { %v1014_v30 = vpop.eup %1013  ;;  %v449_v31 = vadd.f32 1.0, %v1012_v26  ;;  %1033 = vpow2.f32 %v401_v20  ;;  %v361_v32 = vsub.f32 0.0, %v289_v23  ;;  %v292_v33 = vadd.f32 %v902_v28, %v1295_v0  ;;  %v283_v34 = vpop.f32.mrb[19].mxu0 }
 0x14f   :  { %v1016_v35 = vpop.eup %1015  ;;  %v447_v36 = vadd.f32 1.0, %v1014_v30  ;;  %v359_v37 = vsub.f32 0.0, %v281_v27  ;;  %v284_v38 = vadd.f32 %v1295_v0, %v283_v34  ;;  %931 = vmatprep.mubr.bf16.mxu1 %v503_v29 }
 0x150   :  { %v1018_v39 = vpop.eup %1017  ;;  %1035 = vrcp.f32 %v449_v31  ;;  %v450_v40 = vadd.f32 1.0, %v1016_v35  ;;  %v411_v41 = vmul.f32 1.442695, %v361_v32  ;;  %v362_v42 = vsub.f32 0.0, %v292_v33  ;;  %932 = vmatmul.mubr.bf16.vlgmr.msra.gmra.mrb[0].mxu1 %v504_v25 }
 0x151   :  { %v1020_v43 = vpop.eup %1019  ;;  %1037 = vrcp.f32 %v447_v36  ;;  %v448_v44 = vadd.f32 1.0, %v1018_v39  ;;  %v407_v45 = vmul.f32 1.442695, %v359_v37  ;;  %v360_v46 = vsub.f32 0.0, %v284_v38 }
 0x152   :  { %v1022_v47 = vpop.eup %1021  ;;  %1039 = vrcp.f32 %v450_v40  ;;  %v413_v48 = vmul.f32 1.442695, %v362_v42 }
 0x153   :  { %v1024_v49 = vpop.eup %1023  ;;  %1041 = vrcp.f32 %v448_v44  ;;  %v409_v50 = vmul.f32 1.442695, %v360_v46  ;;  %v905_v51 = vpop.f32.mrb[20].mxu0 }
 0x154   :  { %v1026_v52 = vpop.eup %1025  ;;  %1043 = vpow2.f32 %v411_v41  ;;  %v305_v53 = vadd.f32 %v905_v51, %v1295_v0  ;;  %v296_v54 = vpop.f32.mrb[21].mxu0  ;;  %v506_v55 = vpack.c.bf16 %v1024_v49, %v1020_v43 }
 0x155   :  { %v1028_v56 = vpop.eup %1027  ;;  %1045 = vpow2.f32 %v407_v45  ;;  %v297_v57 = vadd.f32 %v1295_v0, %v296_v54  ;;  %v906_v58 = vpop.f32.mrb[22].mxu0  ;;  %v505_v59 = vpack.c.bf16 %v1026_v52, %v1022_v47 }
 0x156   :  { %v1030_v60 = vpop.eup %1029  ;;  %v453_v61 = vadd.f32 1.0, %v1028_v56  ;;  %1047 = vpow2.f32 %v413_v48  ;;  %v365_v62 = vsub.f32 0.0, %v305_v53  ;;  %v308_v63 = vadd.f32 %v906_v58, %v1295_v0  ;;  %v299_v1 = vpop.f32.mrb[23].mxu0 }
 0x157   :  { %v1032_v2 = vpop.eup %1031  ;;  %v451_v3 = vadd.f32 1.0, %v1030_v60  ;;  %1049 = vpow2.f32 %v409_v50  ;;  %v363_v4 = vsub.f32 0.0, %v297_v57  ;;  %v300_v5 = vadd.f32 %v1295_v0, %v299_v1  ;;  %935 = vmatprep.mubr.bf16.mxu1 %v505_v59 }
 0x158   :  { %v1034_v6 = vpop.eup %1033  ;;  %1051 = vrcp.f32 %v453_v61  ;;  %v454_v7 = vadd.f32 1.0, %v1032_v2  ;;  %v419_v8 = vmul.f32 1.442695, %v365_v62  ;;  %v366_v9 = vsub.f32 0.0, %v308_v63  ;;  %936 = vmatmul.mubr.bf16.gmra.mrb[4].mxu1 %v506_v55 }
 0x159   :  { %1053 = vrcp.f32 %v451_v3  ;;  %v452_v10 = vadd.f32 1.0, %v1034_v6  ;;  %v415_v11 = vmul.f32 1.442695, %v363_v4  ;;  %v364_v12 = vsub.f32 0.0, %v300_v5 }
 0x15a   :  { %v1036_v13 = vpop.eup %1035  ;;  %1055 = vrcp.f32 %v454_v7  ;;  %v421_v14 = vmul.f32 1.442695, %v366_v9 }
 0x15b   :  { %v1038_v15 = vpop.eup %1037  ;;  %1057 = vrcp.f32 %v452_v10  ;;  %v417_v16 = vmul.f32 1.442695, %v364_v12  ;;  %v909_v17 = vpop.f32.mrb[24].mxu0 }
 0x15c   :  { %v1040_v18 = vpop.eup %1039  ;;  %1059 = vpow2.f32 %v419_v8  ;;  %v321_v19 = vadd.f32 %v909_v17, %v1295_v0  ;;  %v312_v20 = vpop.f32.mrb[25].mxu0 }
 0x15d   :  { %v1042_v21 = vpop.eup %1041  ;;  %1061 = vpow2.f32 %v415_v11  ;;  %v313_v22 = vadd.f32 %v1295_v0, %v312_v20  ;;  %v910_v23 = vpop.f32.mrb[26].mxu0  ;;  %v508_v24 = vpack.c.bf16 %v1040_v18, %v1036_v13 }
 0x15e   :  { %v1044_v25 = vpop.eup %1043  ;;  %1063 = vpow2.f32 %v421_v14  ;;  %v369_v26 = vsub.f32 0.0, %v321_v19  ;;  %v324_v27 = vadd.f32 %v910_v23, %v1295_v0  ;;  %v315_v28 = vpop.f32.mrb[27].mxu0  ;;  %v507_v29 = vpack.c.bf16 %v1042_v21, %v1038_v15 }
 0x15f   :  { %v1046_v30 = vpop.eup %1045  ;;  %v457_v31 = vadd.f32 1.0, %v1044_v25  ;;  %1065 = vpow2.f32 %v417_v16  ;;  %v367_v32 = vsub.f32 0.0, %v313_v22  ;;  %v316_v33 = vadd.f32 %v1295_v0, %v315_v28 }
 0x160   :  { %v1048_v34 = vpop.eup %1047  ;;  %v455_v35 = vadd.f32 1.0, %v1046_v30  ;;  %v370_v36 = vsub.f32 0.0, %v324_v27  ;;  %939 = vmatprep.mubr.bf16.mxu1 %v507_v29  ;;  %v427_v39 = vmul.f32 1.442695, %v369_v26 }
 0x161   :  { %v1050_v37 = vpop.eup %1049  ;;  %1067 = vrcp.f32 %v457_v31  ;;  %v458_v38 = vadd.f32 1.0, %v1048_v34  ;;  %v368_v40 = vsub.f32 0.0, %v316_v33  ;;  %940 = vmatmul.mubr.bf16.gmra.mrb[8].mxu1 %v508_v24  ;;  %v423_v43 = vmul.f32 1.442695, %v367_v32 }
 0x162   :  { %v1052_v41 = vpop.eup %1051  ;;  %1069 = vrcp.f32 %v455_v35  ;;  %v456_v42 = vadd.f32 1.0, %v1050_v37  ;;  %v429_v45 = vmul.f32 1.442695, %v370_v36 }
 0x163   :  { %v1054_v44 = vpop.eup %1053  ;;  %1071 = vrcp.f32 %v458_v38  ;;  %v913_v46 = vpop.f32.mrb[28].mxu0  ;;  %v425_v48 = vmul.f32 1.442695, %v368_v40 }
 0x164   :  { %v1056_v47 = vpop.eup %1055  ;;  %1073 = vrcp.f32 %v456_v42  ;;  %v337_v49 = vadd.f32 %v913_v46, %v1295_v0  ;;  %v328_v50 = vpop.f32.mrb[29].mxu0 }
 0x165   :  { %v1058_v51 = vpop.eup %1057  ;;  %1075 = vpow2.f32 %v427_v39  ;;  %v329_v52 = vadd.f32 %v1295_v0, %v328_v50  ;;  %v914_v53 = vpop.f32.mrb[30].mxu0  ;;  %v510_v54 = vpack.c.bf16 %v1056_v47, %v1052_v41 }
 0x166   :  { %v1060_v55 = vpop.eup %1059  ;;  %1077 = vpow2.f32 %v423_v43  ;;  %v373_v56 = vsub.f32 0.0, %v337_v49  ;;  %v340_v57 = vadd.f32 %v914_v53, %v1295_v0  ;;  %v331_v58 = vpop.f32.mrb[31].mxu0  ;;  %v509_v59 = vpack.c.bf16 %v1058_v51, %v1054_v44  ;;  %v1332_v51 = vld [vmem:[%s1385_s4] ss:$0 sm:$0xff]  ;;  %s1216_s4 = smov [#allocation8]  }
 0x167   :  { %v1062_v60 = vpop.eup %1061  ;;  %v461_v61 = vadd.f32 1.0, %v1060_v55  ;;  %1079 = vpow2.f32 %v429_v45  ;;  %v371_v62 = vsub.f32 0.0, %v329_v52  ;;  %v332_v63 = vadd.f32 %v1295_v0, %v331_v58  ;;  %s788_s8 = sshll.u32 %s1216_s4, 4  ;;  %s789_s8 = int_to_ptr.vmem [resolvable:$true] %s788_s8 }
 0x168   :  { %v1064_v1 = vpop.eup %1063  ;;  %v459_v2 = vadd.f32 1.0, %v1062_v60  ;;  %1081 = vpow2.f32 %v425_v48  ;;  %v374_v3 = vsub.f32 0.0, %v340_v57  ;;  %943 = vmatprep.mubr.bf16.mxu1 %v509_v59  ;;  %v435_v6 = vmul.f32 1.442695, %v373_v56  ;;  %s1181_s9 = scalar_lea.vmem %s789_s8, 4096  ;;  %p1186_p11 = scmp.lt.s32.totalorder %s789_s8, %s789_s8 }
 0x169   :  { %v1066_v4 = vpop.eup %1065  ;;  %1083 = vrcp.f32 %v461_v61  ;;  %v462_v5 = vadd.f32 1.0, %v1064_v1  ;;  %v372_v7 = vsub.f32 0.0, %v332_v63  ;;  %944 = vmatmul.mubr.bf16.gmra.mrb[12].mxu1 %v510_v54  ;;  %v431_v9 = vmul.f32 1.442695, %v371_v62  ;;  %p1182_p10 = scmp.ne.s32.totalorder %s789_s8, %s1181_s9  ;;  %p1187_p12 = scmp.lt.s32.totalorder %s1181_s9, %s1181_s9 }
 0x16a   :  { %1085 = vrcp.f32 %v459_v2  ;;  %v460_v8 = vadd.f32 1.0, %v1066_v4  ;;  %v437_v11 = vmul.f32 1.442695, %v374_v3 }
 0x16b   :  { %v1068_v10 = vpop.eup %1067  ;;  %1087 = vrcp.f32 %v462_v5  ;;  %v433_v0 = vmul.f32 1.442695, %v372_v7  ;;  %p1188_p13 = por %p1187_p12, %p1186_p11 }
 0x16c   :  { %v1070_v12 = vpop.eup %1069  ;;  %1089 = vrcp.f32 %v460_v8 }
 0x16d   :  { %v1072_v13 = vpop.eup %1071  ;;  %1091 = vpow2.f32 %v435_v6  ;;  %p1189_p0 = pnand %p1188_p13, %p1182_p10 }
 0x16e   :  { %v1074_v14 = vpop.eup %1073  ;;  %1093 = vpow2.f32 %v431_v9  ;;  %v512_v15 = vpack.c.bf16 %v1072_v13, %v1068_v10 }
 0x16f   :  { %v1076_v16 = vpop.eup %1075  ;;  %1095 = vpow2.f32 %v437_v11  ;;  %v511_v17 = vpack.c.bf16 %v1074_v14, %v1070_v12 }
 0x170   :  { %v1078_v18 = vpop.eup %1077  ;;  %v465_v19 = vadd.f32 1.0, %v1076_v16  ;;  %1097 = vpow2.f32 %v433_v0 }
 0x171   :  { %v1080_v20 = vpop.eup %1079  ;;  %v463_v21 = vadd.f32 1.0, %v1078_v18  ;;  %947 = vmatprep.mubr.bf16.mxu1 %v511_v17 }
 0x172   :  { %v1082_v22 = vpop.eup %1081  ;;  %1099 = vrcp.f32 %v465_v19  ;;  %v466_v23 = vadd.f32 1.0, %v1080_v20  ;;  %948 = vmatmul.mubr.bf16.gmra.mrb[16].mxu1 %v512_v15 }
 0x173   :  { %v1084_v24 = vpop.eup %1083  ;;  %1101 = vrcp.f32 %v463_v21  ;;  %v464_v25 = vadd.f32 1.0, %v1082_v22 }
 0x174   :  { %v1086_v26 = vpop.eup %1085  ;;  %1103 = vrcp.f32 %v466_v23 }
 0x175   :  { %v1088_v27 = vpop.eup %1087  ;;  %1105 = vrcp.f32 %v464_v25 }
 0x176   :  { %v1090_v28 = vpop.eup %1089  ;;  %v514_v29 = vpack.c.bf16 %v1088_v27, %v1084_v24 }
 0x177   :  { %v1092_v30 = vpop.eup %1091  ;;  %v513_v31 = vpack.c.bf16 %v1090_v28, %v1086_v26 }
 0x178   :  { %v1094_v32 = vpop.eup %1093  ;;  %v469_v33 = vadd.f32 1.0, %v1092_v30 }
 0x179   :  { %v1096_v34 = vpop.eup %1095  ;;  %v467_v35 = vadd.f32 1.0, %v1094_v32  ;;  %951 = vmatprep.mubr.bf16.mxu1 %v513_v31 }
 0x17a   :  { %v1098_v36 = vpop.eup %1097  ;;  %1107 = vrcp.f32 %v469_v33  ;;  %v470_v37 = vadd.f32 1.0, %v1096_v34  ;;  %952 = vmatmul.mubr.bf16.gmra.mrb[20].mxu1 %v514_v29 }
 0x17b   :  { %1109 = vrcp.f32 %v467_v35  ;;  %v468_v38 = vadd.f32 1.0, %v1098_v36 }
 0x17c   :  { %v1100_v39 = vpop.eup %1099  ;;  %1111 = vrcp.f32 %v470_v37 }
 0x17d   :  { %v1102_v40 = vpop.eup %1101  ;;  %1113 = vrcp.f32 %v468_v38 }
 0x17e   :  { %v1104_v41 = vpop.eup %1103 }
 0x17f   :  { %v1106_v42 = vpop.eup %1105  ;;  %v516_v43 = vpack.c.bf16 %v1104_v41, %v1100_v39 }
 0x180   :  { %v515_v44 = vpack.c.bf16 %v1106_v42, %v1102_v40 }
 0x182   :  { %955 = vmatprep.mubr.bf16.mxu1 %v515_v44 }
 0x183   :  { %956 = vmatmul.mubr.bf16.gmra.mrb[24].mxu1 %v516_v43 }
 0x184   :  { %v1108_v45 = vpop.eup %1107 }
 0x185   :  { %v1110_v46 = vpop.eup %1109 }
 0x186   :  { %v1112_v47 = vpop.eup %1111 }
 0x187   :  { %v1114_v48 = vpop.eup %1113  ;;  %v518_v49 = vpack.c.bf16 %v1112_v47, %v1108_v45 }
 0x188   :  { %v517_v50 = vpack.c.bf16 %v1114_v48, %v1110_v46 }
 0x18a   :  { %959 = vmatprep.mubr.bf16.mxu1 %v517_v50 }
 0x18b   :  { %960 = vmatmul.mubr.bf16.gmra.mrb[28].mxu1 %v518_v49 }
 0x223   :  { %v933_v52 = vpop.f32.mrb[0].mxu1 }
 0x224   :  { %v633_v53 = vadd.f32 %v933_v52, %v1332_v51  ;;  %v624_v54 = vpop.f32.mrb[1].mxu1 }
 0x225   :  { %v625_v55 = vadd.f32 %v1332_v51, %v624_v54  ;;  %v934_v56 = vpop.f32.mrb[2].mxu1 }
 0x226   :  { %753 = vst [vmem:[#allocation8 + $0x10] sm:$0xff] %v633_v53  ;;  %v636_v57 = vadd.f32 %v934_v56, %v1332_v51  ;;  %v627_v58 = vpop.f32.mrb[3].mxu1 }
 0x227   :  { %751 = vst [vmem:[#allocation8] sm:$0xff] %v625_v55  ;;  %v628_v59 = vadd.f32 %v1332_v51, %v627_v58 }
 0x228   :  { %754 = vst [vmem:[#allocation8 + $0x18] sm:$0xff] %v636_v57 }
 0x229   :  { %752 = vst [vmem:[#allocation8 + $0x8] sm:$0xff] %v628_v59 }
 0x22b   :  { %v937_v60 = vpop.f32.mrb[4].mxu1 }
 0x22c   :  { %v649_v61 = vadd.f32 %v937_v60, %v1332_v51  ;;  %v640_v62 = vpop.f32.mrb[5].mxu1 }
 0x22d   :  { %v641_v63 = vadd.f32 %v1332_v51, %v640_v62  ;;  %v938_v1 = vpop.f32.mrb[6].mxu1 }
 0x22e   :  { %757 = vst [vmem:[#allocation8 + $0x30] sm:$0xff] %v649_v61  ;;  %v652_v2 = vadd.f32 %v938_v1, %v1332_v51  ;;  %v643_v3 = vpop.f32.mrb[7].mxu1 }
 0x22f   :  { %755 = vst [vmem:[#allocation8 + $0x20] sm:$0xff] %v641_v63  ;;  %v644_v4 = vadd.f32 %v1332_v51, %v643_v3 }
 0x230   :  { %758 = vst [vmem:[#allocation8 + $0x38] sm:$0xff] %v652_v2 }
 0x231   :  { %756 = vst [vmem:[#allocation8 + $0x28] sm:$0xff] %v644_v4 }
 0x234   :  { %v941_v5 = vpop.f32.mrb[8].mxu1 }
 0x235   :  { %v665_v6 = vadd.f32 %v941_v5, %v1332_v51  ;;  %v656_v7 = vpop.f32.mrb[9].mxu1 }
 0x236   :  { %v657_v8 = vadd.f32 %v1332_v51, %v656_v7  ;;  %v942_v9 = vpop.f32.mrb[10].mxu1 }
 0x237   :  { %761 = vst [vmem:[#allocation8 + $0x50] sm:$0xff] %v665_v6  ;;  %v668_v10 = vadd.f32 %v942_v9, %v1332_v51  ;;  %v659_v11 = vpop.f32.mrb[11].mxu1 }
 0x238   :  { %759 = vst [vmem:[#allocation8 + $0x40] sm:$0xff] %v657_v8  ;;  %v660_v12 = vadd.f32 %v1332_v51, %v659_v11 }
 0x239   :  { %762 = vst [vmem:[#allocation8 + $0x58] sm:$0xff] %v668_v10 }
 0x23a   :  { %760 = vst [vmem:[#allocation8 + $0x48] sm:$0xff] %v660_v12 }
 0x23c   :  { %v945_v0 = vpop.f32.mrb[12].mxu1 }
 0x23d   :  { %v681_v13 = vadd.f32 %v945_v0, %v1332_v51  ;;  %v672_v14 = vpop.f32.mrb[13].mxu1 }
 0x23e   :  { %v673_v15 = vadd.f32 %v1332_v51, %v672_v14  ;;  %v946_v16 = vpop.f32.mrb[14].mxu1 }
 0x23f   :  { %765 = vst [vmem:[#allocation8 + $0x70] sm:$0xff] %v681_v13  ;;  %v684_v17 = vadd.f32 %v946_v16, %v1332_v51  ;;  %v675_v18 = vpop.f32.mrb[15].mxu1 }
 0x240   :  { %763 = vst [vmem:[#allocation8 + $0x60] sm:$0xff] %v673_v15  ;;  %v676_v19 = vadd.f32 %v1332_v51, %v675_v18 }
 0x241   :  { %766 = vst [vmem:[#allocation8 + $0x78] sm:$0xff] %v684_v17 }
 0x242   :  { %764 = vst [vmem:[#allocation8 + $0x68] sm:$0xff] %v676_v19 }
 0x245   :  { %v949_v20 = vpop.f32.mrb[16].mxu1 }
 0x246   :  { %v697_v21 = vadd.f32 %v949_v20, %v1332_v51  ;;  %v688_v22 = vpop.f32.mrb[17].mxu1 }
 0x247   :  { %v689_v23 = vadd.f32 %v1332_v51, %v688_v22  ;;  %v950_v24 = vpop.f32.mrb[18].mxu1 }
 0x248   :  { %769 = vst [vmem:[#allocation8 + $0x90] sm:$0xff] %v697_v21  ;;  %v700_v25 = vadd.f32 %v950_v24, %v1332_v51  ;;  %v691_v26 = vpop.f32.mrb[19].mxu1 }
 0x249   :  { %767 = vst [vmem:[#allocation8 + $0x80] sm:$0xff] %v689_v23  ;;  %v692_v27 = vadd.f32 %v1332_v51, %v691_v26 }
 0x24a   :  { %770 = vst [vmem:[#allocation8 + $0x98] sm:$0xff] %v700_v25 }
 0x24b   :  { %768 = vst [vmem:[#allocation8 + $0x88] sm:$0xff] %v692_v27 }
 0x24d   :  { %v953_v28 = vpop.f32.mrb[20].mxu1 }
 0x24e   :  { %v713_v29 = vadd.f32 %v953_v28, %v1332_v51  ;;  %v704_v30 = vpop.f32.mrb[21].mxu1 }
 0x24f   :  { %v705_v31 = vadd.f32 %v1332_v51, %v704_v30  ;;  %v954_v32 = vpop.f32.mrb[22].mxu1 }
 0x250   :  { %773 = vst [vmem:[#allocation8 + $0xb0] sm:$0xff] %v713_v29  ;;  %v716_v33 = vadd.f32 %v954_v32, %v1332_v51  ;;  %v707_v34 = vpop.f32.mrb[23].mxu1 }
 0x251   :  { %771 = vst [vmem:[#allocation8 + $0xa0] sm:$0xff] %v705_v31  ;;  %v708_v35 = vadd.f32 %v1332_v51, %v707_v34 }
 0x252   :  { %774 = vst [vmem:[#allocation8 + $0xb8] sm:$0xff] %v716_v33 }
 0x253   :  { %772 = vst [vmem:[#allocation8 + $0xa8] sm:$0xff] %v708_v35 }
 0x256   :  { %v957_v36 = vpop.f32.mrb[24].mxu1 }
 0x257   :  { %v729_v37 = vadd.f32 %v957_v36, %v1332_v51  ;;  %v720_v38 = vpop.f32.mrb[25].mxu1 }
 0x258   :  { %v721_v39 = vadd.f32 %v1332_v51, %v720_v38  ;;  %v958_v40 = vpop.f32.mrb[26].mxu1 }
 0x259   :  { %777 = vst [vmem:[#allocation8 + $0xd0] sm:$0xff] %v729_v37  ;;  %v732_v41 = vadd.f32 %v958_v40, %v1332_v51  ;;  %v723_v42 = vpop.f32.mrb[27].mxu1 }
 0x25a   :  { %775 = vst [vmem:[#allocation8 + $0xc0] sm:$0xff] %v721_v39  ;;  %v724_v43 = vadd.f32 %v1332_v51, %v723_v42 }
 0x25b   :  { %778 = vst [vmem:[#allocation8 + $0xd8] sm:$0xff] %v732_v41 }
 0x25c   :  { %776 = vst [vmem:[#allocation8 + $0xc8] sm:$0xff] %v724_v43 }
 0x25e   :  { %v961_v44 = vpop.f32.mrb[28].mxu1 }
 0x25f   :  { %v745_v45 = vadd.f32 %v961_v44, %v1332_v51  ;;  %v736_v46 = vpop.f32.mrb[29].mxu1 }
 0x260   :  { %v737_v47 = vadd.f32 %v1332_v51, %v736_v46  ;;  %v962_v48 = vpop.f32.mrb[30].mxu1 }
 0x261   :  { %781 = vst [vmem:[#allocation8 + $0xf0] sm:$0xff] %v745_v45  ;;  %v748_v49 = vadd.f32 %v962_v48, %v1332_v51  ;;  %v739_v50 = vpop.f32.mrb[31].mxu1 }
 0x262   :  { %779 = vst [vmem:[#allocation8 + $0xe0] sm:$0xff] %v737_v47  ;;  %v740_v52 = vadd.f32 %v1332_v51, %v739_v50 }
 0x263   :  { %782 = vst [vmem:[#allocation8 + $0xf8] sm:$0xff] %v748_v49 }
 0x264   :  { %780 = vst [vmem:[#allocation8 + $0xe8] sm:$0xff] %v740_v52 }
 0x265   :  { %1192 = shalt.err (!%p1189_p0)
}
 0x266   :  { %s1193_s12 = scalar_lea.hbm %s1386_s5, 4096 }
 0x267   :  { %p1194_p1 = scmp.ne.s32.totalorder %s1386_s5, %s1193_s12  ;;  %p1197_p2 = scmp.lt.u32.totalorder %s1193_s12, %s1386_s5 }
 0x269   :  { %p1199_p3 = pnand %p1197_p2, %p1194_p1 }
 0x26b   :  { %1202 = shalt.err (!%p1199_p3)
}
 0x26c   :  { %794 = dma.vmem_to_hbm [thread:$0]  %s789_s8, 4096, %s1386_s5, [#allocation4], %s1213_s1, %s1213_s1, %s1214_s17  }
 0x26d   :  { %1207 = dma.done.wait [#allocation4], 4096  }
 0x26e   :  { %1208 = vsyncadd [#allocation4], 4294963200 }
 0x26f   :  { %798 = vsyncpa [#allocation3], 1 }
 0x270   :  { %799 = vsyncpa [#allocation6], 1 }
 0x271   :  { %800 = vsyncpa [#allocation4], 1 }

</bundles_post_ra>
